<compile_context>
chip_gen: v5e
topology: v5e:2x2
jax: 0.10.0
libtpu: 0.0.40
codegen_flags: <defaults>
</compile_context>

<pallas_src>
import math
import jax
import jax.numpy as jnp
from jax import lax
from jax.experimental import pallas as pl
from jax.experimental.pallas import tpu as pltpu

# dot_general dimension numbers
_NT = (((1,), (1,)), ((), ()))   # A @ B^T  (contract last dim of both)
_NN = (((1,), (0,)), ((), ()))   # A @ B

_MiB = 1024 * 1024
_PROJ_VMEM_BUDGET = 40 * _MiB    # target for tile auto-shrink (fits v7x 64 MiB)
_PROJ_VMEM_LIMIT = 48 * _MiB     # scoped-VMEM limit handed to the compiler


# ----------------------------------------------------------------------------
# Tiling helpers
# ----------------------------------------------------------------------------
def _seq_tile(n, pref):
    """Full dim if small, else `pref` (pref is a multiple of 8/128; ragged
    edges are handled by store clipping (Q/M) or in-kernel masking (K)."""
    return n if n <= pref else pref


def _proj_tiles(n_rows, d_in, d_out, n_mats, x_bytes, w_bytes, o_bytes,
                tm_pref, tn_pref):
    """Pick (tm, tn) for the projection kernels under an explicit VMEM budget.

    Blocks hold the full d_in (no K reduction axis); instead the footprint of
    the double-buffered tiles is computed and tn/tm are shrunk until it fits
    the budget.  # TODO(synk): add a d_in reduction grid axis for d_model large
    enough that even tn=128 tiles overflow the budget.
    """
    tm = n_rows if n_rows <= tm_pref else tm_pref
    tn = d_out if d_out <= tn_pref else tn_pref

    def footprint(tm_, tn_):
        dbl = 2  # Pallas double-buffers every BlockSpec operand
        x = dbl * tm_ * d_in * x_bytes
        w = n_mats * dbl * tn_ * d_in * w_bytes
        b = n_mats * dbl * 8 * max(tn_, 128) * 4
        o = n_mats * dbl * tm_ * tn_ * o_bytes
        return x + w + b + o

    # Shrink tn first (weight tiles dominate), then tm; keep (8,128) legality.
    while footprint(tm, tn) > _PROJ_VMEM_BUDGET and tn >= 256 and tn % 256 == 0:
        tn //= 2
    while footprint(tm, tn) > _PROJ_VMEM_BUDGET and tm >= 16 and tm % 16 == 0:
        tm //= 2
    return tm, tn


# ----------------------------------------------------------------------------
# Linear projection kernels
# ----------------------------------------------------------------------------
def _make_linear_kernel(mxu_dtype):
    def kernel(x_ref, w_ref, b_ref, o_ref):
        # x: (TM, d_in), w: (TN, d_in) [PyTorch layout, already mxu_dtype],
        # b: (1, TN) fp32.  fp32 accumulation, fp32 bias add.
        x = x_ref[...].astype(mxu_dtype)
        acc = lax.dot_general(x, w_ref[...], _NT,
                              preferred_element_type=jnp.float32)
        o_ref[...] = (acc + b_ref[...]).astype(o_ref.dtype)
    return kernel


def pallas_linear(x2d, w, b, *, out_dtype=jnp.float32, mxu_dtype=jnp.bfloat16,
                  tm_pref=256, tn_pref=512):
    """x2d: (N, d_in), w: (d_out, d_in) [PyTorch layout], b: (d_out,)."""
    n, d_in = x2d.shape
    d_out = w.shape[0]
    w = w.astype(mxu_dtype)                       # halve weight HBM traffic
    b = b.reshape(1, d_out).astype(jnp.float32)
    tm, tn = _proj_tiles(n, d_in, d_out, 1,
                         jnp.dtype(x2d.dtype).itemsize,
                         jnp.dtype(mxu_dtype).itemsize,
                         jnp.dtype(out_dtype).itemsize,
                         tm_pref, tn_pref)
    # Grid order: N tiles OUTER, M tiles INNER -> each weight tile stays
    # resident across the whole sequence (weights read from HBM once).
    grid = (pl.cdiv(d_out, tn), pl.cdiv(n, tm))
    return pl.pallas_call(
        _make_linear_kernel(mxu_dtype),
        out_shape=jax.ShapeDtypeStruct((n, d_out), out_dtype),
        grid=grid,
        in_specs=[
            pl.BlockSpec((tm, d_in), lambda j, i: (i, 0)),
            pl.BlockSpec((tn, d_in), lambda j, i: (j, 0)),
            pl.BlockSpec((1, tn), lambda j, i: (0, j)),
        ],
        out_specs=pl.BlockSpec((tm, tn), lambda j, i: (i, j)),
        compiler_params=pltpu.CompilerParams(
            dimension_semantics=("parallel", "parallel"),
            vmem_limit_bytes=_PROJ_VMEM_LIMIT),
    )(x2d, w, b)


def _make_qkv_kernel(mxu_dtype):
    def kernel(x_ref, wq_ref, bq_ref, wk_ref, bk_ref, wv_ref, bv_ref,
               q_ref, k_ref, v_ref):
        # Shared activation tile, three projections -> activation streamed once
        # and cast to the MXU dtype once.
        x = x_ref[...].astype(mxu_dtype)

        def proj(w_ref, b_ref):
            return (lax.dot_general(x, w_ref[...], _NT,
                                    preferred_element_type=jnp.float32)
                    + b_ref[...])

        q_ref[...] = proj(wq_ref, bq_ref).astype(q_ref.dtype)
        k_ref[...] = proj(wk_ref, bk_ref).astype(k_ref.dtype)
        v_ref[...] = proj(wv_ref, bv_ref).astype(v_ref.dtype)
    return kernel


def pallas_qkv_projection(x2d, wq, bq, wk, bk, wv, bv, *,
                          out_dtype=jnp.float32, mxu_dtype=jnp.bfloat16,
                          tm_pref=256, tn_pref=512):
    """Fused Q/K/V projection of a single activation (self-attention path)."""
    n, d_in = x2d.shape
    d_out = wq.shape[0]
    assert wk.shape[0] == d_out and wv.shape[0] == d_out
    wq, wk, wv = (w.astype(mxu_dtype) for w in (wq, wk, wv))
    bq, bk, bv = (b.reshape(1, d_out).astype(jnp.float32) for b in (bq, bk, bv))
    tm, tn = _proj_tiles(n, d_in, d_out, 3,
                         jnp.dtype(x2d.dtype).itemsize,
                         jnp.dtype(mxu_dtype).itemsize,
                         jnp.dtype(out_dtype).itemsize,
                         tm_pref, tn_pref)
    grid = (pl.cdiv(d_out, tn), pl.cdiv(n, tm))   # N outer, M inner
    x_spec = pl.BlockSpec((tm, d_in), lambda j, i: (i, 0))
    w_spec = pl.BlockSpec((tn, d_in), lambda j, i: (j, 0))
    b_spec = pl.BlockSpec((1, tn), lambda j, i: (0, j))
    o_spec = pl.BlockSpec((tm, tn), lambda j, i: (i, j))
    out_sd = jax.ShapeDtypeStruct((n, d_out), out_dtype)
    return pl.pallas_call(
        _make_qkv_kernel(mxu_dtype),
        out_shape=(out_sd, out_sd, out_sd),
        grid=grid,
        in_specs=[x_spec, w_spec, b_spec, w_spec, b_spec, w_spec, b_spec],
        out_specs=(o_spec, o_spec, o_spec),
        compiler_params=pltpu.CompilerParams(
            dimension_semantics=("parallel", "parallel"),
            vmem_limit_bytes=_PROJ_VMEM_LIMIT),
    )(x2d, wq, bq, wk, bk, wv, bv)


# ----------------------------------------------------------------------------
# Flash-style full attention (online softmax, all heads per grid step,
# lane-dense (B, L_Q, H*d_v) output — no head transposes in the wrapper)
# ----------------------------------------------------------------------------
def _make_flash_attn_kernel(H, d_k, d_v, L_K, tk, mxu_dtype):
    ragged_k = (L_K % tk) != 0

    def kernel(q_ref, k_ref, v_ref, o_ref, m_ref, l_ref, acc_ref):
        ki = pl.program_id(2)

        @pl.when(ki == 0)
        def _init():
            m_ref[...] = jnp.full_like(m_ref, -jnp.inf)
            l_ref[...] = jnp.zeros_like(l_ref)
            acc_ref[...] = jnp.zeros_like(acc_ref)

        # q/k/v arrive already in mxu_dtype and the softmax scale is folded
        # into the query projection weights -> no per-K-tile rescale or cast.
        q = q_ref[0]                          # (tq, H*d_k)
        k = k_ref[0]                          # (tk, H*d_k)
        v = v_ref[0]                          # (tk, H*d_v)

        if ragged_k:
            # Mask the ragged last K tile: invalid score columns -> -inf,
            # garbage V rows -> 0 (so 0 * garbage can never produce NaN).
            n_valid = L_K - ki * tk
            col_valid = lax.broadcasted_iota(jnp.int32, (1, tk), 1) < n_valid
            row_valid = lax.broadcasted_iota(jnp.int32, (tk, 1), 0) < n_valid
            v = jnp.where(row_valid, v, jnp.zeros_like(v))

        for h in range(H):                    # static unroll over heads
            # NOTE: non-128-aligned lane slices cost a per-head copy (accepted
            # per review; a head grid axis would need wrapper transposes).
            qh = q[:, h * d_k:(h + 1) * d_k]   # (tq, d_k)
            kh = k[:, h * d_k:(h + 1) * d_k]   # (tk, d_k)
            vh = v[:, h * d_v:(h + 1) * d_v]   # (tk, d_v)

            # Q @ K^T without transposing K (MXU via dot_general), fp32 acc.
            s = lax.dot_general(qh, kh, _NT,
                                preferred_element_type=jnp.float32)  # (tq, tk)
            if ragged_k:
                s = jnp.where(col_valid, s, -jnp.inf)

            m_prev = m_ref[h]                                         # (tq, 1)
            m_new = jnp.maximum(m_prev, jnp.max(s, axis=-1, keepdims=True))
            alpha = jnp.exp(m_prev - m_new)
            p = jnp.exp(s - m_new)                                    # fp32
            l_ref[h] = alpha * l_ref[h] + jnp.sum(p, axis=-1, keepdims=True)
            acc_ref[h] = alpha * acc_ref[h] + lax.dot_general(
                p.astype(mxu_dtype), vh, _NN,
                preferred_element_type=jnp.float32)                   # (tq, d_v)
            m_ref[h] = m_new

        @pl.when(ki == pl.num_programs(2) - 1)
        def _finalize():
            cols = []
            for h in range(H):
                inv = pl.reciprocal(l_ref[h], approx=True)   # EUP slot
                cols.append(acc_ref[h] * inv)
            # Single lane-dense store of the whole (tq, H*d_v) slab.
            o_ref[0] = jnp.concatenate(cols, axis=-1).astype(o_ref.dtype)

    return kernel


def pallas_flash_attention(q, k, v, n_heads, d_k, d_v, *,
                           mxu_dtype=jnp.bfloat16, out_dtype=None,
                           tq_pref=128, tk_pref=128, kv_buffers=2):
    """q: (B, L_Q, H*d_k), k: (B, L_K, H*d_k), v: (B, L_K, H*d_v).

    Returns (B, L_Q, H*d_v) — already in the merged-heads layout the output
    projection wants (no (B,L,H,d) <-> (B,H,L,d) transposes).  The softmax
    scale must already be folded into q (done by the wrapper via wq/bq).
    """
    B, L_Q, _ = q.shape
    L_K = k.shape[1]
    H = n_heads
    out_dtype = out_dtype or q.dtype
    tq = _seq_tile(L_Q, tq_pref)
    tk = _seq_tile(L_K, tk_pref)   # ragged edge handled by in-kernel masking
    kernel = _make_flash_attn_kernel(H, d_k, d_v, L_K, tk, mxu_dtype)
    # Leading axes are 'parallel' (keep B * L_Q//tq >= 2 for v7x's 2 TCs).
    grid = (B, pl.cdiv(L_Q, tq), pl.cdiv(L_K, tk))

    def kv_spec(width):
        kwargs = {}
        if kv_buffers != 2:   # deepen K/V pipelining if profiling shows exposed DMA
            kwargs["pipeline_mode"] = pl.Buffered(kv_buffers)
        return pl.BlockSpec((1, tk, width), lambda b, qi, ki: (b, ki, 0), **kwargs)

    return pl.pallas_call(
        kernel,
        out_shape=jax.ShapeDtypeStruct((B, L_Q, H * d_v), out_dtype),
        grid=grid,
        in_specs=[
            pl.BlockSpec((1, tq, H * d_k), lambda b, qi, ki: (b, qi, 0)),
            kv_spec(H * d_k),
            kv_spec(H * d_v),
        ],
        out_specs=pl.BlockSpec((1, tq, H * d_v), lambda b, qi, ki: (b, qi, 0)),
        scratch_shapes=[
            # (H, tq, 1) pads lanes to 128 — accepted (few hundred KiB max).
            pltpu.VMEM((H, tq, 1), jnp.float32),     # running row max per head
            pltpu.VMEM((H, tq, 1), jnp.float32),     # running denom per head
            pltpu.VMEM((H, tq, d_v), jnp.float32),   # output accumulator
        ],
        compiler_params=pltpu.CompilerParams(
            dimension_semantics=("parallel", "parallel", "arbitrary")),
    )(q, k, v)


# ----------------------------------------------------------------------------
# AttentionLayer.forward (attn_mask=None)
# ----------------------------------------------------------------------------
def attention_layer_forward(params, queries, keys, values, n_heads,
                            mxu_dtype=jnp.bfloat16):
    """Mirrors the PyTorch AttentionLayer.forward with FullAttention inside.

    mxu_dtype=jnp.bfloat16 (default) runs all matmuls on the bf16 MXU path
    with fp32 accumulation and fp32 softmax statistics, and keeps the q/k/v
    and attention-output intermediates in bf16 between kernels.  Pass
    jnp.float32 for a bit-tighter numerical match to the fp32 reference.
    """
    B, L_Q, d_model = queries.shape
    L_K = keys.shape[1]
    L_V = values.shape[1]
    H = n_heads
    d_k = params["wq"].shape[0] // H
    d_v = params["wv"].shape[0] // H
    scale = 1.0 / math.sqrt(d_k)

    # Fold the softmax scale into the query projection (free: weights are
    # constants) so the attention kernel never rescales Q per K tile.
    wq = params["wq"] * scale
    bq = params["bq"] * scale

    fused_ok = (queries is keys) and (keys is values) and \
        (params["wq"].shape[0] == params["wk"].shape[0] == params["wv"].shape[0])
    # NOTE: identity check misses equal-but-distinct arrays (perf-only miss).

    if fused_ok:
        # Self-attention: stream the activation from HBM once for Q/K/V.
        x2d = queries.reshape(B * L_Q, d_model)
        q2, k2, v2 = pallas_qkv_projection(
            x2d, wq, bq, params["wk"], params["bk"], params["wv"], params["bv"],
            out_dtype=mxu_dtype, mxu_dtype=mxu_dtype)
    else:
        q2 = pallas_linear(queries.reshape(B * L_Q, d_model), wq, bq,
                           out_dtype=mxu_dtype, mxu_dtype=mxu_dtype)
        k2 = pallas_linear(keys.reshape(B * L_K, d_model),
                           params["wk"], params["bk"],
                           out_dtype=mxu_dtype, mxu_dtype=mxu_dtype)
        v2 = pallas_linear(values.reshape(B * L_V, d_model),
                           params["wv"], params["bv"],
                           out_dtype=mxu_dtype, mxu_dtype=mxu_dtype)

    # Keep the merged-heads (B, L, H*d) layout; the attention kernel splits
    # heads internally (no wrapper transposes / no extra HBM round trips).
    q = q2.reshape(B, L_Q, H * d_k)
    k = k2.reshape(B, L_K, H * d_k)
    v = v2.reshape(B, L_V, H * d_v)

    out = pallas_flash_attention(q, k, v, H, d_k, d_v,
                                 mxu_dtype=mxu_dtype, out_dtype=mxu_dtype)

    out = pallas_linear(out.reshape(B * L_Q, H * d_v),
                        params["wo"], params["bo"],
                        out_dtype=jnp.float32, mxu_dtype=mxu_dtype)
    return out.reshape(B, L_Q, d_model)


# ----------------------------------------------------------------------------
# Deterministic parameter init (same shapes as nn.Linear in the module)
# ----------------------------------------------------------------------------
def init_params(key, d_model, n_heads, d_keys=None, d_values=None):
    d_keys = d_keys or d_model // n_heads
    d_values = d_values or d_model // n_heads
    ks = jax.random.split(key, 8)

    def lin(kw, kb, out_f, in_f):
        bound = 1.0 / math.sqrt(in_f)
        w = jax.random.uniform(kw, (out_f, in_f), jnp.float32, -bound, bound)
        b = jax.random.uniform(kb, (out_f,), jnp.float32, -bound, bound)
        return w, b

    wq, bq = lin(ks[0], ks[1], d_keys * n_heads, d_model)
    wk, bk = lin(ks[2], ks[3], d_keys * n_heads, d_model)
    wv, bv = lin(ks[4], ks[5], d_values * n_heads, d_model)
    wo, bo = lin(ks[6], ks[7], d_model, d_values * n_heads)
    return dict(wq=wq, bq=bq, wk=wk, bk=bk, wv=wv, bv=bv, wo=wo, bo=bo)


# ----------------------------------------------------------------------------
# Reference (plain JAX) for a sanity check
# ----------------------------------------------------------------------------
def reference_forward(params, queries, keys, values, n_heads):
    B, L_Q, d_model = queries.shape
    H = n_heads
    q = queries @ params["wq"].T + params["bq"]
    k = keys @ params["wk"].T + params["bk"]
    v = values @ params["wv"].T + params["bv"]
    d_k = q.shape[-1] // H
    d_v = v.shape[-1] // H
    q = q.reshape(B, L_Q, H, d_k).transpose(0, 2, 1, 3)
    k = k.reshape(B, keys.shape[1], H, d_k).transpose(0, 2, 1, 3)
    v = v.reshape(B, values.shape[1], H, d_v).transpose(0, 2, 1, 3)
    s = jnp.einsum("bhqd,bhkd->bhqk", q, k) / math.sqrt(d_k)
    a = jax.nn.softmax(s, axis=-1)
    o = jnp.einsum("bhqk,bhkd->bhqd", a, v)
    o = o.transpose(0, 2, 1, 3).reshape(B, L_Q, H * d_v)
    return o @ params["wo"].T + params["bo"]


if __name__ == "__main__":
    B, L, d_model, n_heads = 2, 8, 32, 4

    key = jax.random.PRNGKey(0)
    kp, kq, kk, kv = jax.random.split(key, 4)

    params = init_params(kp, d_model, n_heads)
    queries = jax.random.normal(kq, (B, L, d_model), jnp.float32)
    keys_in = jax.random.normal(kk, (B, L, d_model), jnp.float32)
    values_in = jax.random.normal(kv, (B, L, d_model), jnp.float32)

    # 1) Default bf16 MXU path, cross-attention (separate tiled projections).
    out_bf16 = attention_layer_forward(params, queries, keys_in, values_in, n_heads)
    out_bf16 = jax.block_until_ready(out_bf16)
    ref = reference_forward(params, queries, keys_in, values_in, n_heads)
    assert out_bf16.shape == (B, L, d_model)
    # bf16 MXU operands + bf16 intermediates: loose tolerance vs fp32 reference.
    assert jnp.allclose(out_bf16, ref, atol=5e-2, rtol=5e-2)

    # 2) fp32 MXU path, self-attention (exercises the fused Q/K/V projection);
    #    tight tolerance (only the EUP approx reciprocal differs).
    out_fp32 = attention_layer_forward(params, queries, queries, queries, n_heads,
                                       mxu_dtype=jnp.float32)
    out_fp32 = jax.block_until_ready(out_fp32)
    ref_sa = reference_forward(params, queries, queries, queries, n_heads)
    assert jnp.allclose(out_fp32, ref_sa, atol=2e-3, rtol=2e-3)

    print("KERNEL_OK")
</pallas_src>

<mosaic_0001>
module attributes {stable_mosaic.version = 11 : i64} {
  func.func @kernel(%arg0: i32, %arg1: i32, %arg2: memref<16x32xf32, #tpu.memory_space<vmem>>, %arg3: memref<32x32xbf16, #tpu.memory_space<vmem>>, %arg4: memref<1x32xf32, #tpu.memory_space<vmem>>, %arg5: memref<16x32xbf16, #tpu.memory_space<vmem>>) attributes {dimension_semantics = [#tpu.dimension_semantics<parallel>, #tpu.dimension_semantics<parallel>], iteration_bounds = array<i64: 1, 1>, scalar_prefetch = 0 : i64, scratch_operands = 0 : i64, tpu.core_type = #tpu.core_type<tc>, window_params = [{transform_indices = @transform_0, window_bounds = array<i64: 16, 32>}, {transform_indices = @transform_1, window_bounds = array<i64: 32, 32>}, {transform_indices = @transform_2, window_bounds = array<i64: 1, 32>}, {transform_indices = @transform_3, window_bounds = array<i64: 16, 32>}]} {
    %c0 = arith.constant 0 : index
    %c0_0 = arith.constant 0 : index
    %0 = vector.load %arg2[%c0, %c0_0] : memref<16x32xf32, #tpu.memory_space<vmem>>, vector<16x32xf32>
    %1 = arith.truncf %0 : vector<16x32xf32> to vector<16x32xbf16>
    %c0_1 = arith.constant 0 : index
    %c0_2 = arith.constant 0 : index
    %2 = vector.load %arg3[%c0_1, %c0_2] : memref<32x32xbf16, #tpu.memory_space<vmem>>, vector<32x32xbf16>
    %cst = arith.constant dense<0.000000e+00> : vector<16x32xf32>
    %3 = tpu.matmul %1, %2, %cst {dimension_numbers = #tpu.dot_dimension_numbers<[1], [1], [0], [0], [0, 0, 1, 0], [], []>} : vector<16x32xbf16>, vector<32x32xbf16>, vector<16x32xf32> -> vector<16x32xf32>
    %c0_3 = arith.constant 0 : index
    %c0_4 = arith.constant 0 : index
    %4 = vector.load %arg4[%c0_3, %c0_4] : memref<1x32xf32, #tpu.memory_space<vmem>>, vector<1x32xf32>
    %5 = vector.broadcast %4 : vector<1x32xf32> to vector<16x32xf32>
    %6 = arith.addf %3, %5 : vector<16x32xf32>
    %7 = arith.truncf %6 : vector<16x32xf32> to vector<16x32xbf16>
    %c0_5 = arith.constant 0 : index
    %c0_6 = arith.constant 0 : index
    %8 = vector.load %arg5[%c0_5, %c0_6] : memref<16x32xbf16, #tpu.memory_space<vmem>>, vector<16x32xbf16>
    tpu.vector_store %arg5[%c0_5, %c0_6], %7 {strides = array<i32>} : memref<16x32xbf16, #tpu.memory_space<vmem>>, vector<16x32xbf16>,
    return
  }
  func.func @transform_0(%arg0: i32, %arg1: i32) -> (i32, i32) {
    %c0_i32 = arith.constant 0 : i32
    %c0_i32_0 = arith.constant 0 : i32
    return %arg1, %c0_i32 : i32, i32
  }
  func.func @transform_1(%arg0: i32, %arg1: i32) -> (i32, i32) {
    %c0_i32 = arith.constant 0 : i32
    %c0_i32_0 = arith.constant 0 : i32
    return %arg0, %c0_i32 : i32, i32
  }
  func.func @transform_2(%arg0: i32, %arg1: i32) -> (i32, i32) {
    %c0_i32 = arith.constant 0 : i32
    %c0_i32_0 = arith.constant 0 : i32
    return %c0_i32, %arg0 : i32, i32
  }
  func.func @transform_3(%arg0: i32, %arg1: i32) -> (i32, i32) {
    %c0_i32 = arith.constant 0 : i32
    return %arg1, %arg0 : i32, i32
  }
}

</mosaic_0001>

<bundles_post_ra>
// kernel: tpu_custom_call.1
= control target key start
LH: loop header
LB: loop body
LE: loop exit
PB: predicated region body
PF: predicated region fallthrough
CT: control target
= control target key end

     0   :  { %8 = vsyncpa [#allocation3], 0  ;;  %s260_s0 = inlined_call_operand.hbm [shape: f32[16,32], index: 0, kind: input, shape index: {}]   ;;  %s261_s1 = inlined_call_operand.hbm [shape: bf16[32,32], index: 1, kind: input, shape index: {}]   ;;  %s262_s2 = inlined_call_operand.vmem [shape: f32[1,32], index: 2, kind: input, shape index: {}]   ;;  %s263_s3 = inlined_call_operand.hbm [shape: bf16[16,32], index: 3, kind: output, shape index: {}]  }
   0x1   :  { %9 = vsyncpa [#allocation6], 0 }
   0x2   :  { %10 = vsyncpa [#allocation4], 0  ;;  %s15_s14 = sshll.u32 %s260_s0, 4  ;;  %s215_s15 = smov [#allocation2]   ;;  %s16_s14 = int_to_ptr.hbm [resolvable:$true] %s15_s14 }
   0x3   :  { %s17_s16 = sshll.u32 %s215_s15, 4  ;;  %s28_s19 = sshll.u32 %s261_s1, 4  ;;  %s18_s16 = int_to_ptr.vmem [resolvable:$true] %s17_s16  ;;  %s29_s19 = int_to_ptr.hbm [resolvable:$true] %s28_s19 }
   0x4   :  { %s216_s20 = smov 128   ;;  %s217_s21 = smov 8  }
   0x5   :  { %23 = dma.hbm_to_vmem [thread:$0]  %s16_s14, 256, %s18_s16, [#allocation3], %s216_s20, %s216_s20, %s217_s21  }
   0x6   :  { %s218_s22 = smov [#allocation5]   ;;  %s219_s24 = smov 64  }
   0x7   :  { %s30_s23 = sshll.u32 %s218_s22, 4  ;;  %s220_s25 = smov 4   ;;  %s31_s23 = int_to_ptr.vmem [resolvable:$true] %s30_s23 }
   0x8   :  { %36 = dma.hbm_to_vmem [thread:$0]  %s29_s19, 256, %s31_s23, [#allocation6], %s219_s24, %s219_s24, %s220_s25  }
   0x9   :  { %209 = dma.done.wait [#allocation3], 256  }
   0xa   :  { %210 = vsyncadd [#allocation3], 4294967040 }
   0xb   :  { %211 = dma.done.wait [#allocation6], 256  }
   0xc   :  { %212 = vsyncadd [#allocation6], 4294967040  ;;  %vm69_vm0 = vcmask 261120   ;;  %v128_v0 = vld [vmem:[#allocation5 + $0x8] sm:$0xff]  ;;  %v127_v2 = vld [vmem:[#allocation5] sm:$0xff]  ;;  %vm95_vm1 = vcmask 257024  }
   0xd   :  { %v77_v1 = vsel %vm69_vm0, %v128_v0, 0  ;;  %v74_v3 = vsel %vm69_vm0, %v127_v2, 0  ;;  %v48_v4 = vld [vmem:[#allocation2] sm:$0xff]  ;;  %v49_v5 = vld [vmem:[#allocation2 + $0x8] sm:$0xff]  ;;  %s221_s26 = smov [#allocation7]   ;;  %s104_s30 = sshll.u32 %s263_s3, 4  ;;  %s105_s30 = int_to_ptr.hbm [resolvable:$true] %s104_s30 }
   0xe   :  { %85 = vmatpush.bf16.xpose.msra.mxu0 %v77_v1  ;;  %v50_v6 = vpack.c.bf16 %v49_v5, %v48_v4  ;;  %v136_v7 = vld [vmem:[%s262_s2] ss:$0 sm:$0xff]  ;;  %s102_s27 = sshll.u32 %s221_s26, 4  ;;  %s103_s27 = int_to_ptr.vmem [resolvable:$true] %s102_s27 }
  0x16   :  { %86 = vmatpush.bf16.xpose.msra.mxu0 %v74_v3 }
  0x1d   :  { %126 = vmatmul.msk.bf16.vlgmr.msra.gmra.mxu0 %vm69_vm0, %v50_v6 }
  0x9a   :  { %v88_v8 = vpop.f32.mrf.mxu0 }
  0x9b   :  { %v89_v9 = vadd.f32 %v136_v7, %v88_v8 }
  0x9d   :  { %v93_v10 = vpack.c.bf16 %v89_v9, %v89_v9 }
  0x9f   :  { %96 = vst.msk [vmem:[#allocation7] sm:$0xf] %vm95_vm1, %v93_v10 }
  0xa2   :  { %v90_v11 = vpop.f32.mrf.mxu0 }
  0xa3   :  { %v91_v12 = vadd.f32 %v136_v7, %v90_v11 }
  0xa5   :  { %v94_v13 = vpack.c.bf16 %v91_v12, %v91_v12 }
  0xa7   :  { %97 = vst.msk [vmem:[#allocation7 + $0x4] sm:$0xf] %vm95_vm1, %v94_v13 }
  0xa8   :  { %110 = dma.vmem_to_hbm [thread:$0]  %s103_s27, 128, %s105_s30, [#allocation4], %s219_s24, %s219_s24, %s220_s25  }
  0xa9   :  { %213 = dma.done.wait [#allocation4], 128  }
  0xaa   :  { %214 = vsyncadd [#allocation4], 4294967168 }
  0xab   :  { %115 = vsyncpa [#allocation3], 1 }
  0xac   :  { %116 = vsyncpa [#allocation6], 1 }
  0xad   :  { %117 = vsyncpa [#allocation4], 1 }

</bundles_post_ra>
